<compile_context>
chip_gen: v7x
topology: tpu7x:2x2x1
jax: 0.10.0
libtpu: 0.0.40
codegen_flags: <defaults>
</compile_context>

<pallas_src>
import jax
import jax.numpy as jnp
from jax.experimental import pallas as pl
from jax.experimental.pallas import tpu as pltpu

_LANES = 128          # vreg lane width
_SUBLANES = 8         # vreg sublane count (f32)
_MAX_TILE_ROWS = 1024 # 1024 x 128 x 4B = 512 KiB per output block (double-buffered ~1 MiB)


def _round_up(x: int, m: int) -> int:
    return ((x + m - 1) // m) * m


def _zero_fill_kernel(pos_hbm_ref, out_ref):
    # pos_hbm_ref is a raw HBM ref (memory_space=pl.ANY); intentionally never read.
    del pos_hbm_ref
    # Write-only: full-width lane-dense zero store of the current (tile_rows, 128) block.
    out_ref[...] = jnp.zeros_like(out_ref)


def zero_model_forward(types, positions, edge_index, batch=None):
    """Mirrors ZeroModel.forward: ignores types/edge_index/batch, returns (energy, forces)."""
    del types, edge_index, batch
    n, d = positions.shape
    total = n * d

    # Lane-dense slab: flatten forces to (rows, 128), rows padded to a sublane multiple.
    rows = _round_up(max(pl.cdiv(total, _LANES), 1), _SUBLANES)
    if rows <= _MAX_TILE_ROWS:
        tile_rows = rows
        padded_rows = rows
    else:
        tile_rows = _MAX_TILE_ROWS
        padded_rows = _round_up(rows, tile_rows)
    grid = (padded_rows // tile_rows,)

    forces_flat = pl.pallas_call(
        _zero_fill_kernel,
        out_shape=jax.ShapeDtypeStruct((padded_rows, _LANES), positions.dtype),
        grid=grid,
        in_specs=[pl.BlockSpec(memory_space=pl.ANY)],  # no HBM->VMEM copy generated
        out_specs=pl.BlockSpec((tile_rows, _LANES), lambda i: (i, 0)),
        compiler_params=pltpu.CompilerParams(
            dimension_semantics=("parallel",),  # v7x: both TensorCores split the zero-fill
        ),
    )(positions)

    forces = forces_flat.reshape(-1)[:total].reshape(n, d)

    # Energy is a single constant scalar — emit from the wrapper instead of burning a
    # padded (8,128) VMEM tile + writeback DMA inside the kernel.
    energy = jnp.zeros((1, 1), dtype=jnp.float32)
    return energy, forces


if __name__ == "__main__":
    key = jax.random.PRNGKey(0)
    k_pos, k_types = jax.random.split(key)

    n_atoms = 8
    positions = jax.random.normal(k_pos, (n_atoms, 3), dtype=jnp.float32)
    types = jax.random.randint(k_types, (n_atoms,), 0, 4, dtype=jnp.int32)
    edge_index = jnp.zeros((2, 16), dtype=jnp.int32)
    batch = jnp.zeros((n_atoms,), dtype=jnp.int32)

    energy, forces = zero_model_forward(types, positions, edge_index, batch)
    jax.block_until_ready((energy, forces))

    assert energy.shape == (1, 1) and energy.dtype == jnp.float32
    assert forces.shape == positions.shape and forces.dtype == positions.dtype
    assert bool(jnp.all(energy == 0.0)) and bool(jnp.all(forces == 0.0))

    print("KERNEL_OK")
</pallas_src>

<mosaic_0001>
module attributes {stable_mosaic.version = 11 : i64} {
  func.func @_zero_fill_kernel(%arg0: i32, %arg1: memref<8x3xf32, #tpu.memory_space<any>>, %arg2: memref<8x128xf32, #tpu.memory_space<vmem>>) attributes {dimension_semantics = [#tpu.dimension_semantics<parallel>], iteration_bounds = array<i64: 1>, scalar_prefetch = 0 : i64, scratch_operands = 0 : i64, tpu.core_type = #tpu.core_type<tc>, window_params = [{}, {transform_indices = @transform_1, window_bounds = array<i64: 8, 128>}]} {
    %cst = arith.constant 0.000000e+00 : f32
    %0 = vector.broadcast %cst : f32 to vector<8x128xf32>
    %c0 = arith.constant 0 : index
    %c0_0 = arith.constant 0 : index
    %1 = vector.load %arg2[%c0, %c0_0] : memref<8x128xf32, #tpu.memory_space<vmem>>, vector<8x128xf32>
    tpu.vector_store %arg2[%c0, %c0_0], %0 {strides = array<i32>} : memref<8x128xf32, #tpu.memory_space<vmem>>, vector<8x128xf32>,
    return
  }
  func.func @transform_1(%arg0: i32) -> (i32, i32) {
    %c0_i32 = arith.constant 0 : i32
    %c0_i32_0 = arith.constant 0 : i32
    return %arg0, %c0_i32 : i32, i32
  }
}

</mosaic_0001>

<bundles_post_ra>
// kernel: tpu_custom_call.1
= control target key start
LH: loop header
LB: loop body
LE: loop exit
PB: predicated region body
PF: predicated region fallthrough
CT: control target
= control target key end

     0   :  { %6 = vsyncpa [#allocation3], 0  ;;  %v48_v0 = vmov 0.0   ;;  %s49_s6 = smov [#allocation2]   ;;  %s72_s0 = inlined_call_operand.vmem [shape: f32[8,3], index: 0, kind: input, shape index: {}]   ;;  %s73_s1 = inlined_call_operand.hbm [shape: f32[8,128], index: 1, kind: output, shape index: {}]  }
   0x1   :  { %7 = vst [vmem:[#allocation2] sm:$0xff] %v48_v0  ;;  %s14_s7 = sshll.u32 %s49_s6, 4  ;;  %s15_s7 = int_to_ptr.vmem [resolvable:$true] %s14_s7 }
   0x2   :  { %s24_s8 = scalar_lea.vmem %s15_s7, 128  ;;  %p29_p1 = scmp.lt.s32.totalorder %s15_s7, %s15_s7 }
   0x3   :  { %p25_p0 = scmp.ne.s32.totalorder %s15_s7, %s24_s8  ;;  %p30_p2 = scmp.lt.s32.totalorder %s24_s8, %s24_s8 }
   0x5   :  { %p31_p3 = por %p30_p2, %p29_p1 }
   0x7   :  { %p32_p4 = pnand %p31_p3, %p25_p0 }
   0x9   :  { %35 = shalt.err (!%p32_p4)
}
   0xa   :  { %s36_s0 = scalar_lea.hbm %s73_s1, 128 }
   0xb   :  { %p37_p5 = scmp.ne.s32.totalorder %s73_s1, %s36_s0  ;;  %p40_p6 = scmp.lt.u32.totalorder %s36_s0, %s73_s1 }
   0xd   :  { %p42_p7 = pnand %p40_p6, %p37_p5 }
   0xf   :  { %45 = shalt.err (!%p42_p7)
}
  0x10   :  { %17 = dma.vmem_to_hbm [thread:$0]  %s15_s7, 128, %s73_s1, [#allocation3]  }
  0x11   :  { %46 = dma.done.wait [#allocation3], 128  }
  0x12   :  { %47 = vsyncadd [#allocation3], 4294967168 }
  0x13   :  { %21 = vsyncpa [#allocation3], 1 }

</bundles_post_ra>
